<compile_context>
chip_gen: v6e
topology: v6e:2x2x1
jax: 0.10.0
libtpu: 0.0.40
codegen_flags: <defaults>
</compile_context>

<pallas_src>
import warnings

import jax
import jax.numpy as jnp
from jax.experimental import pallas as pl
from jax.experimental.pallas import tpu as pltpu


def _round_up(n, m):
    return ((n + m - 1) // m) * m


def _probe_buffered():
    """Does this jax support single-buffering via pipeline_mode=pl.Buffered?"""
    try:
        pl.BlockSpec((8, 128), lambda i: (0, 0), pipeline_mode=pl.Buffered(1))
        return True
    except (TypeError, AttributeError):
        warnings.warn(
            "pl.Buffered/pipeline_mode unavailable: grid-invariant weights "
            "will be double-buffered (2x VMEM residency; hurts most on v7x's "
            "64 MiB VMEM).")
        return False


_HAS_BUFFERED = _probe_buffered()


def _default_block_b():
    # v5e's MXU is 4x128^2 -> 128-row tiles already fill it and halve the
    # intermediate/spill traffic through its single vector-store slot.
    # v6e/v7x (2x256^2 MXUs) prefer 256-row tiles.
    try:
        kind = jax.devices()[0].device_kind.lower()
    except Exception:  # pragma: no cover - defensive
        return 256
    return 128 if "v5" in kind else 256


def mlp_kernel(x_ref, w1_ref, b1_ref, w2_ref, b2_ref, w3_ref, b3_ref, o_ref):
    # x tile arrives f32 straight from HBM; cast to bf16 on the VPU (free).
    # Matmuls feed the MXU in bf16 and accumulate in f32; bias+ReLU in f32;
    # the live inter-layer value is kept bf16 to halve spill/VMEM bytes.
    x = x_ref[...].astype(jnp.bfloat16)

    h1 = jnp.dot(x, w1_ref[...], preferred_element_type=jnp.float32)
    h1 = jnp.maximum(h1 + b1_ref[...], 0.0).astype(jnp.bfloat16)

    h2 = jnp.dot(h1, w2_ref[...], preferred_element_type=jnp.float32)
    h2 = jnp.maximum(h2 + b2_ref[...], 0.0).astype(jnp.bfloat16)

    h3 = jnp.dot(h2, w3_ref[...], preferred_element_type=jnp.float32)
    h3 = jnp.maximum(h3 + b3_ref[...], 0.0)

    o_ref[...] = h3.astype(o_ref.dtype)


def _resident_spec(block_shape):
    """BlockSpec for grid-invariant tensors (weights/biases)."""
    if _HAS_BUFFERED:
        return pl.BlockSpec(block_shape, lambda i: (0, 0),
                            pipeline_mode=pl.Buffered(1))
    return pl.BlockSpec(block_shape, lambda i: (0, 0))


def mlp_forward(x, params, *, block_b=None, out_dtype=jnp.float32):
    """x: [B, ...] (flattened to [B, in_dim], like torch's x.flatten(1)).

    Returns [B, h_dim] in `out_dtype` (default f32 = torch semantics; pass
    jnp.bfloat16 to halve the output writeback if the consumer allows)."""
    B = x.shape[0]
    x2d = x.reshape(B, -1)                 # keep f32; bf16 cast happens in-kernel
    in_dim = x2d.shape[1]
    w1, b1, w2, b2, w3, b3 = params
    assert w1.shape[0] == in_dim
    h_dim = w1.shape[1]

    if block_b is None:
        block_b = _default_block_b()

    # Lane-dense K: only pad when the feature axis isn't already a multiple of
    # 128 (no-op for the common in_dim=1024 case). Zero padding is exact.
    K = _round_up(in_dim, 128)
    if K != in_dim:
        x2d = jnp.pad(x2d, ((0, 0), (0, K - in_dim)))
        w1 = jnp.pad(w1, ((0, K - in_dim), (0, 0)))

    # Batch tile: multiple of 16 (bf16 packs 16 rows per sublane pair); when
    # the batch is large, shrink so there are >=4 grid steps (>=2 per v7x
    # TensorCore) so x-in / out-out DMA actually overlaps compute.
    tb = min(block_b, _round_up(B, 16))
    if B >= 4 * 128:
        tb = min(tb, max(128, _round_up(pl.cdiv(B, 4), 16)))
    B_pad = _round_up(B, tb)
    if B_pad != B:
        x2d = jnp.pad(x2d, ((0, B_pad - B), (0, 0)))

    # VMEM budget: resident weights + biases, double-buffered x/out tiles.
    weight_bytes = ((K * h_dim + 2 * h_dim * h_dim) * w1.dtype.itemsize
                    + 3 * h_dim * 4)
    io_bytes = (2 * tb * K * x2d.dtype.itemsize
                + 2 * tb * h_dim * jnp.dtype(out_dtype).itemsize)
    vmem_est = weight_bytes * (1 if _HAS_BUFFERED else 2) + io_bytes + (2 << 20)
    vmem_limit = None
    if vmem_est > (24 << 20):
        # TODO(synk): past h_dim ~2K the resident weights no longer fit v7x's
        # 64 MiB VMEM — add a second ('arbitrary') grid axis tiling the
        # output-feature blocks of w2/w3 (h2 in VMEM scratch) instead of just
        # raising the scoped limit.
        vmem_limit = int(min(vmem_est + (8 << 20), 100 << 20))

    grid = (B_pad // tb,)
    out = pl.pallas_call(
        mlp_kernel,
        out_shape=jax.ShapeDtypeStruct((B_pad, h_dim), out_dtype),
        grid_spec=pltpu.PrefetchScalarGridSpec(
            num_scalar_prefetch=0,
            grid=grid,
            in_specs=[
                pl.BlockSpec((tb, K), lambda i: (i, 0)),   # x tile (pipelined)
                _resident_spec((K, h_dim)),                # w1 (resident)
                _resident_spec((1, h_dim)),                # b1
                _resident_spec((h_dim, h_dim)),            # w2
                _resident_spec((1, h_dim)),                # b2
                _resident_spec((h_dim, h_dim)),            # w3
                _resident_spec((1, h_dim)),                # b3
            ],
            out_specs=pl.BlockSpec((tb, h_dim), lambda i: (i, 0)),
        ),
        compiler_params=pltpu.CompilerParams(
            dimension_semantics=("parallel",),
            vmem_limit_bytes=vmem_limit),
    )(x2d, w1, b1, w2, b2, w3, b3)
    return out[:B]


def init_params(key, in_dim, h_dim):
    """nn.Linear-style init: uniform(-1/sqrt(fan_in), 1/sqrt(fan_in)).
    Weights stored bf16 as [in, out]; biases f32 as [1, out]."""
    ks = jax.random.split(key, 6)

    def linear(kw, kb, fan_in, fan_out):
        bound = 1.0 / jnp.sqrt(jnp.float32(fan_in))
        w = jax.random.uniform(kw, (fan_in, fan_out), jnp.float32, -bound, bound)
        b = jax.random.uniform(kb, (1, fan_out), jnp.float32, -bound, bound)
        return w.astype(jnp.bfloat16), b

    w1, b1 = linear(ks[0], ks[1], in_dim, h_dim)
    w2, b2 = linear(ks[2], ks[3], h_dim, h_dim)
    w3, b3 = linear(ks[4], ks[5], h_dim, h_dim)
    return (w1, b1, w2, b2, w3, b3)


if __name__ == "__main__":
    key = jax.random.PRNGKey(0)
    k_x, k_p = jax.random.split(key)

    # The module flattens a [B, 4, 16, 16] input to [B, 1024]; hidden dim 256
    # (the nn.Module default). Small batch per the test spec.
    B, C, H, W = 2, 4, 16, 16
    in_dim = C * H * W
    h_dim = 256

    x = jax.random.normal(k_x, (B, C, H, W), jnp.float32)
    params = init_params(k_p, in_dim, h_dim)

    out = jax.block_until_ready(mlp_forward(x, params))

    # Pure-JAX reference with the same bf16 quantization points as the kernel.
    # Note: error vs a true f32 torch nn.Linear stack would be larger since
    # weights/activations are quantized to bf16 here by design.
    w1, b1, w2, b2, w3, b3 = params
    f32 = jnp.float32
    hp = jax.lax.Precision.HIGHEST
    xq = x.reshape(B, -1).astype(jnp.bfloat16).astype(f32)
    ref = jnp.maximum(jnp.dot(xq, w1.astype(f32), precision=hp) + b1, 0.0)
    ref = jnp.maximum(jnp.dot(ref.astype(jnp.bfloat16).astype(f32),
                              w2.astype(f32), precision=hp) + b2, 0.0)
    ref = jnp.maximum(jnp.dot(ref.astype(jnp.bfloat16).astype(f32),
                              w3.astype(f32), precision=hp) + b3, 0.0)

    assert out.shape == (B, h_dim)
    assert out.dtype == jnp.float32
    max_err = jnp.max(jnp.abs(out - ref))
    assert jnp.allclose(out, ref, atol=2e-2, rtol=2e-2), f"max abs err {max_err}"

    print("KERNEL_OK")
</pallas_src>

<mosaic_0001>
module attributes {stable_mosaic.version = 11 : i64} {
  func.func @mlp_kernel(%arg0: i32, %arg1: memref<16x1024xf32, #tpu.memory_space<vmem>>, %arg2: memref<1024x256xbf16, #tpu.memory_space<vmem>>, %arg3: memref<1x256xf32, #tpu.memory_space<vmem>>, %arg4: memref<256x256xbf16, #tpu.memory_space<vmem>>, %arg5: memref<1x256xf32, #tpu.memory_space<vmem>>, %arg6: memref<256x256xbf16, #tpu.memory_space<vmem>>, %arg7: memref<1x256xf32, #tpu.memory_space<vmem>>, %arg8: memref<16x256xf32, #tpu.memory_space<vmem>>) attributes {dimension_semantics = [#tpu.dimension_semantics<parallel>], iteration_bounds = array<i64: 1>, scalar_prefetch = 0 : i64, scratch_operands = 0 : i64, tpu.core_type = #tpu.core_type<tc>, window_params = [{transform_indices = @transform_0, window_bounds = array<i64: 16, 1024>}, {pipeline_mode = #tpu.pipeline_mode<synchronous>, transform_indices = @transform_1, window_bounds = array<i64: 1024, 256>}, {pipeline_mode = #tpu.pipeline_mode<synchronous>, transform_indices = @transform_2, window_bounds = array<i64: 1, 256>}, {pipeline_mode = #tpu.pipeline_mode<synchronous>, transform_indices = @transform_3, window_bounds = array<i64: 256, 256>}, {pipeline_mode = #tpu.pipeline_mode<synchronous>, transform_indices = @transform_4, window_bounds = array<i64: 1, 256>}, {pipeline_mode = #tpu.pipeline_mode<synchronous>, transform_indices = @transform_5, window_bounds = array<i64: 256, 256>}, {pipeline_mode = #tpu.pipeline_mode<synchronous>, transform_indices = @transform_6, window_bounds = array<i64: 1, 256>}, {transform_indices = @transform_7, window_bounds = array<i64: 16, 256>}]} {
    %c0 = arith.constant 0 : index
    %c0_0 = arith.constant 0 : index
    %0 = vector.load %arg1[%c0, %c0_0] : memref<16x1024xf32, #tpu.memory_space<vmem>>, vector<16x1024xf32>
    %1 = arith.truncf %0 : vector<16x1024xf32> to vector<16x1024xbf16>
    %c0_1 = arith.constant 0 : index
    %c0_2 = arith.constant 0 : index
    %2 = vector.load %arg2[%c0_1, %c0_2] : memref<1024x256xbf16, #tpu.memory_space<vmem>>, vector<1024x256xbf16>
    %cst = arith.constant dense<0.000000e+00> : vector<16x256xf32>
    %3 = tpu.matmul %1, %2, %cst {dimension_numbers = #tpu.dot_dimension_numbers<[1], [0], [0], [1], [0, 0, 1, 1], [], []>} : vector<16x1024xbf16>, vector<1024x256xbf16>, vector<16x256xf32> -> vector<16x256xf32>
    %c0_3 = arith.constant 0 : index
    %c0_4 = arith.constant 0 : index
    %4 = vector.load %arg3[%c0_3, %c0_4] : memref<1x256xf32, #tpu.memory_space<vmem>>, vector<1x256xf32>
    %5 = vector.broadcast %4 : vector<1x256xf32> to vector<16x256xf32>
    %6 = arith.addf %3, %5 : vector<16x256xf32>
    %cst_5 = arith.constant 0.000000e+00 : f32
    %7 = vector.broadcast %cst_5 : f32 to vector<16x256xf32>
    %8 = arith.maximumf %6, %7 : vector<16x256xf32>
    %9 = arith.truncf %8 : vector<16x256xf32> to vector<16x256xbf16>
    %c0_6 = arith.constant 0 : index
    %c0_7 = arith.constant 0 : index
    %10 = vector.load %arg4[%c0_6, %c0_7] : memref<256x256xbf16, #tpu.memory_space<vmem>>, vector<256x256xbf16>
    %cst_8 = arith.constant dense<0.000000e+00> : vector<16x256xf32>
    %11 = tpu.matmul %9, %10, %cst_8 {dimension_numbers = #tpu.dot_dimension_numbers<[1], [0], [0], [1], [0, 0, 1, 1], [], []>} : vector<16x256xbf16>, vector<256x256xbf16>, vector<16x256xf32> -> vector<16x256xf32>
    %c0_9 = arith.constant 0 : index
    %c0_10 = arith.constant 0 : index
    %12 = vector.load %arg5[%c0_9, %c0_10] : memref<1x256xf32, #tpu.memory_space<vmem>>, vector<1x256xf32>
    %13 = vector.broadcast %12 : vector<1x256xf32> to vector<16x256xf32>
    %14 = arith.addf %11, %13 : vector<16x256xf32>
    %cst_11 = arith.constant 0.000000e+00 : f32
    %15 = vector.broadcast %cst_11 : f32 to vector<16x256xf32>
    %16 = arith.maximumf %14, %15 : vector<16x256xf32>
    %17 = arith.truncf %16 : vector<16x256xf32> to vector<16x256xbf16>
    %c0_12 = arith.constant 0 : index
    %c0_13 = arith.constant 0 : index
    %18 = vector.load %arg6[%c0_12, %c0_13] : memref<256x256xbf16, #tpu.memory_space<vmem>>, vector<256x256xbf16>
    %cst_14 = arith.constant dense<0.000000e+00> : vector<16x256xf32>
    %19 = tpu.matmul %17, %18, %cst_14 {dimension_numbers = #tpu.dot_dimension_numbers<[1], [0], [0], [1], [0, 0, 1, 1], [], []>} : vector<16x256xbf16>, vector<256x256xbf16>, vector<16x256xf32> -> vector<16x256xf32>
    %c0_15 = arith.constant 0 : index
    %c0_16 = arith.constant 0 : index
    %20 = vector.load %arg7[%c0_15, %c0_16] : memref<1x256xf32, #tpu.memory_space<vmem>>, vector<1x256xf32>
    %21 = vector.broadcast %20 : vector<1x256xf32> to vector<16x256xf32>
    %22 = arith.addf %19, %21 : vector<16x256xf32>
    %cst_17 = arith.constant 0.000000e+00 : f32
    %23 = vector.broadcast %cst_17 : f32 to vector<16x256xf32>
    %24 = arith.maximumf %22, %23 : vector<16x256xf32>
    %c0_18 = arith.constant 0 : index
    %c0_19 = arith.constant 0 : index
    %25 = vector.load %arg8[%c0_18, %c0_19] : memref<16x256xf32, #tpu.memory_space<vmem>>, vector<16x256xf32>
    tpu.vector_store %arg8[%c0_18, %c0_19], %24 {strides = array<i32>} : memref<16x256xf32, #tpu.memory_space<vmem>>, vector<16x256xf32>,
    return
  }
  func.func @transform_0(%arg0: i32) -> (i32, i32) {
    %c0_i32 = arith.constant 0 : i32
    %c0_i32_0 = arith.constant 0 : i32
    return %arg0, %c0_i32 : i32, i32
  }
  func.func @transform_1(%arg0: i32) -> (i32, i32) {
    %c0_i32 = arith.constant 0 : i32
    %c0_i32_0 = arith.constant 0 : i32
    %c0_i32_1 = arith.constant 0 : i32
    return %c0_i32, %c0_i32_0 : i32, i32
  }
  func.func @transform_2(%arg0: i32) -> (i32, i32) {
    %c0_i32 = arith.constant 0 : i32
    %c0_i32_0 = arith.constant 0 : i32
    %c0_i32_1 = arith.constant 0 : i32
    return %c0_i32, %c0_i32_0 : i32, i32
  }
  func.func @transform_3(%arg0: i32) -> (i32, i32) {
    %c0_i32 = arith.constant 0 : i32
    %c0_i32_0 = arith.constant 0 : i32
    %c0_i32_1 = arith.constant 0 : i32
    return %c0_i32, %c0_i32_0 : i32, i32
  }
  func.func @transform_4(%arg0: i32) -> (i32, i32) {
    %c0_i32 = arith.constant 0 : i32
    %c0_i32_0 = arith.constant 0 : i32
    %c0_i32_1 = arith.constant 0 : i32
    return %c0_i32, %c0_i32_0 : i32, i32
  }
  func.func @transform_5(%arg0: i32) -> (i32, i32) {
    %c0_i32 = arith.constant 0 : i32
    %c0_i32_0 = arith.constant 0 : i32
    %c0_i32_1 = arith.constant 0 : i32
    return %c0_i32, %c0_i32_0 : i32, i32
  }
  func.func @transform_6(%arg0: i32) -> (i32, i32) {
    %c0_i32 = arith.constant 0 : i32
    %c0_i32_0 = arith.constant 0 : i32
    %c0_i32_1 = arith.constant 0 : i32
    return %c0_i32, %c0_i32_0 : i32, i32
  }
  func.func @transform_7(%arg0: i32) -> (i32, i32) {
    %c0_i32 = arith.constant 0 : i32
    %c0_i32_0 = arith.constant 0 : i32
    return %arg0, %c0_i32 : i32, i32
  }
}

</mosaic_0001>

<bundles_post_ra>
// kernel: tpu_custom_call.1
= control target key start
LH: loop header
LB: loop body
LE: loop exit
PB: predicated region body
PF: predicated region fallthrough
CT: control target
= control target key end

     0   :  { %12 = vsyncpa [#allocation3], 0  ;;  %s2284_s0 = inlined_call_operand.hbm [shape: f32[16,1024], index: 0, kind: input, shape index: {}]   ;;  %s2285_s1 = inlined_call_operand.hbm [shape: bf16[1024,256], index: 1, kind: input, shape index: {}]   ;;  %s2286_s2 = inlined_call_operand.vmem [shape: f32[1,256], index: 2, kind: input, shape index: {}]   ;;  %s2287_s3 = inlined_call_operand.hbm [shape: bf16[256,256], index: 3, kind: input, shape index: {}]   ;;  %s2288_s4 = inlined_call_operand.vmem [shape: f32[1,256], index: 4, kind: input, shape index: {}]   ;;  %s2289_s5 = inlined_call_operand.hbm [shape: bf16[256,256], index: 5, kind: input, shape index: {}]   ;;  %s2290_s6 = inlined_call_operand.vmem [shape: f32[1,256], index: 6, kind: input, shape index: {}]   ;;  %s2291_s7 = inlined_call_operand.hbm [shape: f32[16,256], index: 7, kind: output, shape index: {}]  }
   0x1   :  { %13 = vsyncpa [#allocation6], 0 }
   0x2   :  { %14 = vsyncpa [#allocation9], 0 }
   0x3   :  { %15 = vsyncpa [#allocation4], 0  ;;  %s2190_s24 = smov [#allocation5]  }
   0x4   :  { %s33_s25 = sshll.u32 %s2190_s24, 4  ;;  %s34_s25 = int_to_ptr.vmem [resolvable:$true] %s33_s25 }
   0x5   :  { %s2090_s26 = scalar_lea.vmem %s34_s25, 16384  ;;  %p2095_p1 = scmp.lt.s32.totalorder %s34_s25, %s34_s25 }
   0x6   :  { %p2091_p0 = scmp.ne.s32.totalorder %s34_s25, %s2090_s26  ;;  %p2096_p2 = scmp.lt.s32.totalorder %s2090_s26, %s2090_s26 }
   0x8   :  { %p2097_p3 = por %p2096_p2, %p2095_p1 }
   0xa   :  { %p2098_p4 = pnand %p2097_p3, %p2091_p0 }
   0xc   :  { %2101 = shalt.err (!%p2098_p4)
}
   0xd   :  { %s2191_s27 = smov 128   ;;  %s2192_s28 = smov 8  }
   0xe   :  { %39 = dma.hbm_to_vmem [thread:$0]  %s2285_s1, 16384, %s34_s25, [#allocation6], %s2191_s27, %s2191_s27, %s2192_s28  }
   0xf   :  { %s2193_s8 = smov [#allocation2]  }
  0x10   :  { %s21_s9 = sshll.u32 %s2193_s8, 4  ;;  %s22_s9 = int_to_ptr.vmem [resolvable:$true] %s21_s9 }
  0x11   :  { %s2110_s10 = scalar_lea.vmem %s22_s9, 2048  ;;  %p2115_p6 = scmp.lt.s32.totalorder %s22_s9, %s22_s9 }
  0x12   :  { %p2111_p5 = scmp.ne.s32.totalorder %s22_s9, %s2110_s10  ;;  %p2116_p7 = scmp.lt.s32.totalorder %s2110_s10, %s2110_s10 }
  0x14   :  { %p2117_p8 = por %p2116_p7, %p2115_p6 }
  0x16   :  { %p2118_p9 = pnand %p2117_p8, %p2111_p5 }
  0x18   :  { %2121 = shalt.err (!%p2118_p9)
}
  0x19   :  { %s2194_s11 = smov 1024   ;;  %s2195_s12 = smov 64  }
  0x1a   :  { %27 = dma.hbm_to_vmem [thread:$0]  %s2284_s0, 2048, %s22_s9, [#allocation3], %s2194_s11, %s2194_s11, %s2195_s12  }
  0x1b   :  { %s2196_s15 = smov [#allocation7]   ;;  %s2197_s17 = smov [#allocation8]  }
  0x1c   :  { %s47_s16 = sshll.u32 %s2196_s15, 4  ;;  %s61_s1 = sshll.u32 %s2197_s17, 4  ;;  %s48_s16 = int_to_ptr.vmem [resolvable:$true] %s47_s16  ;;  %s62_s1 = int_to_ptr.vmem [resolvable:$true] %s61_s1 }
  0x1d   :  { %s2130_s18 = scalar_lea.vmem %s48_s16, 4096  ;;  %p2135_p11 = scmp.lt.s32.totalorder %s48_s16, %s48_s16 }
  0x1e   :  { %p2131_p10 = scmp.ne.s32.totalorder %s48_s16, %s2130_s18  ;;  %p2136_p12 = scmp.lt.s32.totalorder %s2130_s18, %s2130_s18 }
  0x20   :  { %p2137_p13 = por %p2136_p12, %p2135_p11 }
  0x22   :  { %p2138_p0 = pnand %p2137_p13, %p2131_p10 }
  0x24   :  { %2141 = shalt.err (!%p2138_p0)
}
  0x25   :  { %53 = dma.hbm_to_vmem [thread:$0]  %s2287_s3, 4096, %s48_s16, [#allocation6], %s2191_s27, %s2191_s27, %s2192_s28  }
  0x26   :  { %s2150_s0 = scalar_lea.vmem %s62_s1, 4096  ;;  %p2155_p2 = scmp.lt.s32.totalorder %s62_s1, %s62_s1 }
  0x27   :  { %p2151_p1 = scmp.ne.s32.totalorder %s62_s1, %s2150_s0  ;;  %p2156_p3 = scmp.lt.s32.totalorder %s2150_s0, %s2150_s0 }
  0x29   :  { %p2157_p4 = por %p2156_p3, %p2155_p2 }
  0x2b   :  { %p2158_p5 = pnand %p2157_p4, %p2151_p1 }
  0x2d   :  { %2161 = shalt.err (!%p2158_p5)
}
  0x2e   :  { %67 = dma.hbm_to_vmem [thread:$0]  %s2289_s5, 4096, %s62_s1, [#allocation9], %s2191_s27, %s2191_s27, %s2192_s28  }
  0x2f   :  { %2182 = dma.done.wait [#allocation3], 2048  }
  0x30   :  { %2183 = vsyncadd [#allocation3], 4294965248 }
  0x31   :  { %2184 = dma.done.wait [#allocation6], 20480  }
  0x32   :  { %2185 = vsyncadd [#allocation6], 4294946816 }
  0x33   :  { %2186 = dma.done.wait [#allocation9], 4096  }
  0x34   :  { %2187 = vsyncadd [#allocation9], 4294963200  ;;  %v1794_v0 = vld [vmem:[#allocation5 + $0x74] ss:$8 sps:$4 sm:$0xff]   ;;  %v1798_v2 = vld [vmem:[#allocation5 + $0x70] ss:$8 sps:$4 sm:$0xff]  }
  0x35   :  { %v1796_v1 = vld [vmem:[#allocation5 + $0x174] ss:$8 sps:$4 sm:$0xff]   ;;  %886 = vmatprep.subr.bf16.mxu0 %v1794_v0  ;;  %v1799_v3 = vld [vmem:[#allocation5 + $0x170] ss:$8 sps:$4 sm:$0xff]   ;;  %v1800_v4 = vld [vmem:[#allocation5 + $0x64] ss:$8 sps:$4 sm:$0xff]  }
  0x36   :  { %929 = vmatprep.subr.bf16.mxu1 %v1796_v1  ;;  %887 = vmatpush1.bf16.msra.mxu0 %v1798_v2  ;;  %v1802_v5 = vld [vmem:[#allocation5 + $0x164] ss:$8 sps:$4 sm:$0xff]   ;;  %v1804_v6 = vld [vmem:[#allocation5 + $0x60] ss:$8 sps:$4 sm:$0xff]   ;;  %v1806_v8 = vld [vmem:[#allocation5 + $0x54] ss:$8 sps:$4 sm:$0xff]  }
  0x37   :  { %930 = vmatpush1.bf16.msra.mxu1 %v1799_v3  ;;  %888 = vmatprep.subr.bf16.mxu0 %v1800_v4  ;;  %v1805_v7 = vld [vmem:[#allocation5 + $0x160] ss:$8 sps:$4 sm:$0xff]   ;;  %v1808_v9 = vld [vmem:[#allocation5 + $0x154] ss:$8 sps:$4 sm:$0xff]   ;;  %v1810_v10 = vld [vmem:[#allocation5 + $0x50] ss:$8 sps:$4 sm:$0xff]  }
  0x38   :  { %931 = vmatprep.subr.bf16.mxu1 %v1802_v5  ;;  %v1811_v11 = vld [vmem:[#allocation5 + $0x150] ss:$8 sps:$4 sm:$0xff]   ;;  %v1812_v12 = vld [vmem:[#allocation5 + $0x44] ss:$8 sps:$4 sm:$0xff]   ;;  %v1816_v14 = vld [vmem:[#allocation5 + $0x40] ss:$8 sps:$4 sm:$0xff]  }
  0x39   :  { %v1814_v13 = vld [vmem:[#allocation5 + $0x144] ss:$8 sps:$4 sm:$0xff]   ;;  %v1817_v15 = vld [vmem:[#allocation5 + $0x140] ss:$8 sps:$4 sm:$0xff]   ;;  %v1818_v16 = vld [vmem:[#allocation5 + $0x34] ss:$8 sps:$4 sm:$0xff]  }
  0x3a   :  { %889 = vmatpush1.bf16.msra.mxu0 %v1804_v6  ;;  %v1820_v17 = vld [vmem:[#allocation5 + $0x134] ss:$8 sps:$4 sm:$0xff]   ;;  %v1822_v18 = vld [vmem:[#allocation5 + $0x30] ss:$8 sps:$4 sm:$0xff]   ;;  %v1824_v20 = vld [vmem:[#allocation5 + $0x24] ss:$8 sps:$4 sm:$0xff]  }
  0x3b   :  { %932 = vmatpush1.bf16.msra.mxu1 %v1805_v7  ;;  %890 = vmatprep.subr.bf16.mxu0 %v1806_v8  ;;  %v1823_v19 = vld [vmem:[#allocation5 + $0x130] ss:$8 sps:$4 sm:$0xff]   ;;  %v1826_v21 = vld [vmem:[#allocation5 + $0x124] ss:$8 sps:$4 sm:$0xff]   ;;  %v1828_v22 = vld [vmem:[#allocation5 + $0x20] ss:$8 sps:$4 sm:$0xff]  }
  0x3c   :  { %933 = vmatprep.subr.bf16.mxu1 %v1808_v9  ;;  %v1829_v23 = vld [vmem:[#allocation5 + $0x120] ss:$8 sps:$4 sm:$0xff]   ;;  %v1830_v24 = vld [vmem:[#allocation5 + $0x14] ss:$8 sps:$4 sm:$0xff]   ;;  %v1834_v26 = vld [vmem:[#allocation5 + $0x10] ss:$8 sps:$4 sm:$0xff]  }
  0x3d   :  { %v1832_v25 = vld [vmem:[#allocation5 + $0x114] ss:$8 sps:$4 sm:$0xff]   ;;  %v1835_v27 = vld [vmem:[#allocation5 + $0x110] ss:$8 sps:$4 sm:$0xff]   ;;  %v1836_v28 = vld [vmem:[#allocation5 + $0x4] ss:$8 sps:$4 sm:$0xff]  }
  0x3e   :  { %891 = vmatpush1.bf16.msra.mxu0 %v1810_v10  ;;  %v1838_v29 = vld [vmem:[#allocation5 + $0x104] ss:$8 sps:$4 sm:$0xff]   ;;  %v1840_v30 = vld [vmem:[#allocation5] ss:$8 sps:$4 sm:$0xff]   ;;  %v1842_v32 = vld [vmem:[#allocation5 + $0xf4] ss:$8 sps:$4 sm:$0xff]  }
  0x3f   :  { %934 = vmatpush1.bf16.msra.mxu1 %v1811_v11  ;;  %892 = vmatprep.subr.bf16.mxu0 %v1812_v12  ;;  %v1841_v31 = vld [vmem:[#allocation5 + $0x100] ss:$8 sps:$4 sm:$0xff]   ;;  %v1844_v33 = vld [vmem:[#allocation5 + $0x1f4] ss:$8 sps:$4 sm:$0xff]   ;;  %v1846_v34 = vld [vmem:[#allocation5 + $0xf0] ss:$8 sps:$4 sm:$0xff]  }
  0x40   :  { %935 = vmatprep.subr.bf16.mxu1 %v1814_v13  ;;  %v1847_v35 = vld [vmem:[#allocation5 + $0x1f0] ss:$8 sps:$4 sm:$0xff]   ;;  %v1848_v36 = vld [vmem:[#allocation5 + $0xe4] ss:$8 sps:$4 sm:$0xff]   ;;  %v1852_v38 = vld [vmem:[#allocation5 + $0xe0] ss:$8 sps:$4 sm:$0xff]  }
  0x41   :  { %v1850_v37 = vld [vmem:[#allocation5 + $0x1e4] ss:$8 sps:$4 sm:$0xff]   ;;  %v1853_v39 = vld [vmem:[#allocation5 + $0x1e0] ss:$8 sps:$4 sm:$0xff]   ;;  %v1854_v40 = vld [vmem:[#allocation5 + $0xd4] ss:$8 sps:$4 sm:$0xff]  }
  0x42   :  { %893 = vmatpush1.bf16.msra.mxu0 %v1816_v14  ;;  %v1856_v41 = vld [vmem:[#allocation5 + $0x1d4] ss:$8 sps:$4 sm:$0xff]   ;;  %v1858_v42 = vld [vmem:[#allocation5 + $0xd0] ss:$8 sps:$4 sm:$0xff]   ;;  %v1860_v44 = vld [vmem:[#allocation5 + $0xc4] ss:$8 sps:$4 sm:$0xff]  }
  0x43   :  { %936 = vmatpush1.bf16.msra.mxu1 %v1817_v15  ;;  %894 = vmatprep.subr.bf16.mxu0 %v1818_v16  ;;  %v1859_v43 = vld [vmem:[#allocation5 + $0x1d0] ss:$8 sps:$4 sm:$0xff]   ;;  %v1862_v45 = vld [vmem:[#allocation5 + $0x1c4] ss:$8 sps:$4 sm:$0xff]   ;;  %v1864_v50 = vld [vmem:[#allocation5 + $0xc0] ss:$8 sps:$4 sm:$0xff]  }
  0x44   :  { %937 = vmatprep.subr.bf16.mxu1 %v1820_v17  ;;  %v83_v46 = vld [vmem:[#allocation2 + $0x8] sm:$0xff]  ;;  %v85_v48 = vld [vmem:[#allocation2 + $0x18] sm:$0xff]  ;;  %v82_v6 = vld [vmem:[#allocation2] sm:$0xff]  ;;  %s2198_s25 = smov [#allocation10]  }
  0x45   :  { %v91_v47 = vld [vmem:[#allocation2 + $0x48] sm:$0xff]  ;;  %v93_v49 = vld [vmem:[#allocation2 + $0x58] sm:$0xff]  ;;  %v90_v7 = vld [vmem:[#allocation2 + $0x40] sm:$0xff]  ;;  %s1577_s26 = sshll.u32 %s2198_s25, 4  ;;  %s1578_s26 = int_to_ptr.vmem [resolvable:$true] %s1577_s26 }
  0x46   :  { %895 = vmatpush1.bf16.msra.mxu0 %v1822_v18  ;;  %v1865_v51 = vld [vmem:[#allocation5 + $0x1c0] ss:$8 sps:$4 sm:$0xff]   ;;  %v1866_v52 = vld [vmem:[#allocation5 + $0xb4] ss:$8 sps:$4 sm:$0xff]   ;;  %v99_v53 = vpack.c.bf16 %v91_v47, %v83_v46  ;;  %v101_v54 = vpack.c.bf16 %v93_v49, %v85_v48  ;;  %v1870_v56 = vld [vmem:[#allocation5 + $0xb0] ss:$8 sps:$4 sm:$0xff]   ;;  %v98_v12 = vpack.c.bf16 %v90_v7, %v82_v6  ;;  %p2167_p7 = scmp.lt.s32.totalorder %s1578_s26, %s1578_s26 }
  0x47   :  { %938 = vmatpush1.bf16.msra.mxu1 %v1823_v19  ;;  %896 = vmatprep.subr.bf16.mxu0 %v1824_v20  ;;  %v1868_v55 = vld [vmem:[#allocation5 + $0x1b4] ss:$8 sps:$4 sm:$0xff]   ;;  %v1871_v57 = vld [vmem:[#allocation5 + $0x1b0] ss:$8 sps:$4 sm:$0xff]   ;;  %v1872_v58 = vld [vmem:[#allocation5 + $0xa4] ss:$8 sps:$4 sm:$0xff]  }
  0x48   :  { %939 = vmatprep.subr.bf16.mxu1 %v1826_v21  ;;  %918 = vmatprep.mubr.bf16.mxu0 %v99_v53  ;;  %v1874_v59 = vld [vmem:[#allocation5 + $0x1a4] ss:$8 sps:$4 sm:$0xff]   ;;  %v1876_v60 = vld [vmem:[#allocation5 + $0xa0] ss:$8 sps:$4 sm:$0xff]   ;;  %v1878_v62 = vld [vmem:[#allocation5 + $0x94] ss:$8 sps:$4 sm:$0xff]  }
  0x49   :  { %961 = vmatprep.mubr.bf16.mxu1 %v101_v54  ;;  %v1877_v61 = vld [vmem:[#allocation5 + $0x1a0] ss:$8 sps:$4 sm:$0xff]   ;;  %v1880_v63 = vld [vmem:[#allocation5 + $0x194] ss:$8 sps:$4 sm:$0xff]   ;;  %v1882_v0 = vld [vmem:[#allocation5 + $0x90] ss:$8 sps:$4 sm:$0xff]  }
  0x4a   :  { %897 = vmatpush1.bf16.msra.mxu0 %v1828_v22  ;;  %v1883_v1 = vld [vmem:[#allocation5 + $0x190] ss:$8 sps:$4 sm:$0xff]   ;;  %v1884_v2 = vld [vmem:[#allocation5 + $0x84] ss:$8 sps:$4 sm:$0xff]   ;;  %v1888_v4 = vld [vmem:[#allocation5 + $0x80] ss:$8 sps:$4 sm:$0xff]  }
  0x4b   :  { %940 = vmatpush1.bf16.msra.mxu1 %v1829_v23  ;;  %898 = vmatprep.subr.bf16.mxu0 %v1830_v24  ;;  %v1886_v3 = vld [vmem:[#allocation5 + $0x184] ss:$8 sps:$4 sm:$0xff]   ;;  %v1889_v5 = vld [vmem:[#allocation5 + $0x180] ss:$8 sps:$4 sm:$0xff]   ;;  %v84_v8 = vld [vmem:[#allocation2 + $0x10] sm:$0xff] }
  0x4c   :  { %941 = vmatprep.subr.bf16.mxu1 %v1832_v25  ;;  %v92_v9 = vld [vmem:[#allocation2 + $0x50] sm:$0xff]  ;;  %v1898_v16 = vld [vmem:[#allocation5 + $0x264] ss:$8 sps:$4 sm:$0xff]   ;;  %v1896_v18 = vld [vmem:[#allocation5 + $0x260] ss:$8 sps:$4 sm:$0xff]  }
  0x4d   :  { %v1892_v10 = vld [vmem:[#allocation5 + $0x274] ss:$8 sps:$4 sm:$0xff]   ;;  %v100_v13 = vpack.c.bf16 %v92_v9, %v84_v8  ;;  %v1890_v14 = vld [vmem:[#allocation5 + $0x270] ss:$8 sps:$4 sm:$0xff]   ;;  %v1901_v17 = vld [vmem:[#allocation5 + $0x364] ss:$8 sps:$4 sm:$0xff]  }
  0x4e   :  { %899 = vmatpush1.bf16.msra.mxu0 %v1834_v26  ;;  %v1895_v11 = vld [vmem:[#allocation5 + $0x374] ss:$8 sps:$4 sm:$0xff]   ;;  %v1893_v15 = vld [vmem:[#allocation5 + $0x370] ss:$8 sps:$4 sm:$0xff]   ;;  %v1899_v19 = vld [vmem:[#allocation5 + $0x360] ss:$8 sps:$4 sm:$0xff]  }
  0x4f   :  { %942 = vmatpush1.bf16.msra.mxu1 %v1835_v27  ;;  %900 = vmatprep.subr.bf16.mxu0 %v1836_v28  ;;  %v1904_v20 = vld [vmem:[#allocation5 + $0x254] ss:$8 sps:$4 sm:$0xff]   ;;  %v1902_v22 = vld [vmem:[#allocation5 + $0x250] ss:$8 sps:$4 sm:$0xff]   ;;  %v1910_v24 = vld [vmem:[#allocation5 + $0x244] ss:$8 sps:$4 sm:$0xff]  }
  0x50   :  { %943 = vmatprep.subr.bf16.mxu1 %v1838_v29  ;;  %v1907_v21 = vld [vmem:[#allocation5 + $0x354] ss:$8 sps:$4 sm:$0xff]   ;;  %v1905_v23 = vld [vmem:[#allocation5 + $0x350] ss:$8 sps:$4 sm:$0xff]   ;;  %v1913_v25 = vld [vmem:[#allocation5 + $0x344] ss:$8 sps:$4 sm:$0xff]  }
  0x51   :  { %v1908_v26 = vld [vmem:[#allocation5 + $0x240] ss:$8 sps:$4 sm:$0xff]   ;;  %v1916_v28 = vld [vmem:[#allocation5 + $0x234] ss:$8 sps:$4 sm:$0xff]   ;;  %v1941_v53 = vld [vmem:[#allocation5 + $0x3f0] ss:$8 sps:$4 sm:$0xff]  }
  0x52   :  { %901 = vmatpush1.bf16.msra.mxu0 %v1840_v30  ;;  %v1911_v27 = vld [vmem:[#allocation5 + $0x340] ss:$8 sps:$4 sm:$0xff]   ;;  %v1919_v29 = vld [vmem:[#allocation5 + $0x334] ss:$8 sps:$4 sm:$0xff]   ;;  %v1914_v30 = vld [vmem:[#allocation5 + $0x230] ss:$8 sps:$4 sm:$0xff]  }
  0x53   :  { %944 = vmatpush1.bf16.msra.mxu1 %v1841_v31  ;;  %902 = vmatprep.subr.bf16.mxu0 %v1842_v32  ;;  %v1917_v31 = vld [vmem:[#allocation5 + $0x330] ss:$8 sps:$4 sm:$0xff]   ;;  %v1922_v32 = vld [vmem:[#allocation5 + $0x224] ss:$8 sps:$4 sm:$0xff]   ;;  %v1932_v47 = vld [vmem:[#allocation5 + $0x200] ss:$8 sps:$4 sm:$0xff]  }
  0x54   :  { %945 = vmatprep.subr.bf16.mxu1 %v1844_v33  ;;  %v1925_v33 = vld [vmem:[#allocation5 + $0x324] ss:$8 sps:$4 sm:$0xff]   ;;  %v97_v46 = vld [vmem:[#allocation2 + $0x78] sm:$0xff]  ;;  %v1935_v48 = vld [vmem:[#allocation5 + $0x300] ss:$8 sps:$4 sm:$0xff]  }
  0x55   :  { %v1946_v54 = vld [vmem:[#allocation5 + $0x2e4] ss:$8 sps:$4 sm:$0xff]   ;;  %v1968_v8 = vld [vmem:[#allocation5 + $0x2a0] ss:$8 sps:$4 sm:$0xff]  }
  0x56   :  { %903 = vmatpush2.bf16.msra.mxu0 %v1846_v34  ;;  %v1920_v34 = vld [vmem:[#allocation5 + $0x220] ss:$8 sps:$4 sm:$0xff]   ;;  %v1970_v6 = vld [vmem:[#allocation5 + $0x2a4] ss:$8 sps:$4 sm:$0xff]  }
  0x57   :  { %946 = vmatpush2.bf16.msra.mxu1 %v1847_v35  ;;  %904 = vmatprep.subr.bf16.mxu0 %v1848_v36  ;;  %v1923_v35 = vld [vmem:[#allocation5 + $0x320] ss:$8 sps:$4 sm:$0xff]   ;;  %v1928_v36 = vld [vmem:[#allocation5 + $0x214] ss:$8 sps:$4 sm:$0xff]   ;;  %v1973_v7 = vld [vmem:[#allocation5 + $0x3a4] ss:$8 sps:$4 sm:$0xff]  }
  0x58   :  { %947 = vmatprep.subr.bf16.mxu1 %v1850_v37  ;;  %v1931_v37 = vld [vmem:[#allocation5 + $0x314] ss:$8 sps:$4 sm:$0xff]   ;;  %v1971_v9 = vld [vmem:[#allocation5 + $0x3a0] ss:$8 sps:$4 sm:$0xff]  }
  0x5a   :  { %905 = vmatpush2.bf16.msra.mxu0 %v1852_v38  ;;  %v1926_v38 = vld [vmem:[#allocation5 + $0x210] ss:$8 sps:$4 sm:$0xff]  }
  0x5b   :  { %948 = vmatpush2.bf16.msra.mxu1 %v1853_v39  ;;  %906 = vmatprep.subr.bf16.mxu0 %v1854_v40  ;;  %v1929_v39 = vld [vmem:[#allocation5 + $0x310] ss:$8 sps:$4 sm:$0xff]   ;;  %v87_v40 = vld [vmem:[#allocation2 + $0x28] sm:$0xff] }
  0x5c   :  { %949 = vmatprep.subr.bf16.mxu1 %v1856_v41  ;;  %v95_v41 = vld [vmem:[#allocation2 + $0x68] sm:$0xff] }
  0x5e   :  { %907 = vmatpush2.bf16.msra.mxu0 %v1858_v42  ;;  %v89_v42 = vld [vmem:[#allocation2 + $0x38] sm:$0xff] }
  0x5f   :  { %950 = vmatpush2.bf16.msra.mxu1 %v1859_v43  ;;  %908 = vmatprep.subr.bf16.mxu0 %v1860_v44  ;;  %v1934_v43 = vld [vmem:[#allocation5 + $0x204] ss:$8 sps:$4 sm:$0xff]   ;;  %v105_v49 = vpack.c.bf16 %v97_v46, %v89_v42 }
  0x60   :  { %951 = vmatprep.subr.bf16.mxu1 %v1862_v45  ;;  %v1937_v44 = vld [vmem:[#allocation5 + $0x304] ss:$8 sps:$4 sm:$0xff]   ;;  %v103_v45 = vpack.c.bf16 %v95_v41, %v87_v40  ;;  %v2012_v40 = vld [vmem:[#allocation7 + $0xf4] ss:$8 sps:$4 sm:$0xff]   ;;  %v2010_v41 = vld [vmem:[#allocation7 + $0xf0] ss:$8 sps:$4 sm:$0xff]  }
  0x61   :  { %v2015_v42 = vld [vmem:[#allocation7 + $0xe4] ss:$8 sps:$4 sm:$0xff]  }
  0x62   :  { %909 = vmatpush2.bf16.msra.mxu0 %v1864_v50  ;;  %v1940_v50 = vld [vmem:[#allocation5 + $0x2f4] ss:$8 sps:$4 sm:$0xff]   ;;  %v2021_v46 = vld [vmem:[#allocation7 + $0xc4] ss:$8 sps:$4 sm:$0xff]  }
  0x63   :  { %952 = vmatpush2.bf16.msra.mxu1 %v1865_v51  ;;  %910 = vmatprep.subr.bf16.mxu0 %v1866_v52  ;;  %v1943_v51 = vld [vmem:[#allocation5 + $0x3f4] ss:$8 sps:$4 sm:$0xff]   ;;  %v1938_v52 = vld [vmem:[#allocation5 + $0x2f0] ss:$8 sps:$4 sm:$0xff]  }
  0x64   :  { %953 = vmatprep.subr.bf16.mxu1 %v1868_v55  ;;  %v1949_v55 = vld [vmem:[#allocation5 + $0x3e4] ss:$8 sps:$4 sm:$0xff]  }
  0x66   :  { %911 = vmatpush2.bf16.msra.mxu0 %v1870_v56  ;;  %v1944_v56 = vld [vmem:[#allocation5 + $0x2e0] ss:$8 sps:$4 sm:$0xff]  }
  0x67   :  { %954 = vmatpush2.bf16.msra.mxu1 %v1871_v57  ;;  %912 = vmatprep.subr.bf16.mxu0 %v1872_v58  ;;  %v1947_v57 = vld [vmem:[#allocation5 + $0x3e0] ss:$8 sps:$4 sm:$0xff]   ;;  %v1952_v58 = vld [vmem:[#allocation5 + $0x2d4] ss:$8 sps:$4 sm:$0xff]  }
  0x68   :  { %955 = vmatprep.subr.bf16.mxu1 %v1874_v59  ;;  %v1955_v59 = vld [vmem:[#allocation5 + $0x3d4] ss:$8 sps:$4 sm:$0xff]  }
  0x6a   :  { %913 = vmatpush2.bf16.msra.mxu0 %v1876_v60  ;;  %v1950_v60 = vld [vmem:[#allocation5 + $0x2d0] ss:$8 sps:$4 sm:$0xff]  }
  0x6b   :  { %956 = vmatpush2.bf16.msra.mxu1 %v1877_v61  ;;  %914 = vmatprep.subr.bf16.mxu0 %v1878_v62  ;;  %v1953_v61 = vld [vmem:[#allocation5 + $0x3d0] ss:$8 sps:$4 sm:$0xff]   ;;  %v1958_v62 = vld [vmem:[#allocation5 + $0x2c4] ss:$8 sps:$4 sm:$0xff]  }
  0x6c   :  { %957 = vmatprep.subr.bf16.mxu1 %v1880_v63  ;;  %v1961_v63 = vld [vmem:[#allocation5 + $0x3c4] ss:$8 sps:$4 sm:$0xff]  }
  0x6e   :  { %915 = vmatpush2.bf16.msra.mxu0 %v1882_v0  ;;  %v1956_v0 = vld [vmem:[#allocation5 + $0x2c0] ss:$8 sps:$4 sm:$0xff]  }
  0x6f   :  { %958 = vmatpush2.bf16.msra.mxu1 %v1883_v1  ;;  %916 = vmatprep.subr.bf16.mxu0 %v1884_v2  ;;  %v1959_v1 = vld [vmem:[#allocation5 + $0x3c0] ss:$8 sps:$4 sm:$0xff]   ;;  %v1964_v2 = vld [vmem:[#allocation5 + $0x2b4] ss:$8 sps:$4 sm:$0xff]  }
  0x70   :  { %959 = vmatprep.subr.bf16.mxu1 %v1886_v3  ;;  %v1967_v3 = vld [vmem:[#allocation5 + $0x3b4] ss:$8 sps:$4 sm:$0xff]  }
  0x72   :  { %917 = vmatpush2.bf16.msra.mxu0 %v1888_v4  ;;  %v1962_v4 = vld [vmem:[#allocation5 + $0x2b0] ss:$8 sps:$4 sm:$0xff]  }
  0x73   :  { %960 = vmatpush2.bf16.msra.mxu1 %v1889_v5  ;;  %972 = vmatprep.subr.bf16.mxu0 %v1892_v10  ;;  %v1965_v5 = vld [vmem:[#allocation5 + $0x3b0] ss:$8 sps:$4 sm:$0xff]   ;;  %v1976_v10 = vld [vmem:[#allocation5 + $0x294] ss:$8 sps:$4 sm:$0xff]  }
  0x74   :  { %1015 = vmatprep.subr.bf16.mxu1 %v1895_v11  ;;  %v1979_v11 = vld [vmem:[#allocation5 + $0x394] ss:$8 sps:$4 sm:$0xff]  }
  0x75   :  { %919 = vmatmul.mubr.bf16.vlgmr.msra.gmra.mxu0 %v98_v12  ;;  %v1974_v12 = vld [vmem:[#allocation5 + $0x290] ss:$8 sps:$4 sm:$0xff]  }
  0x76   :  { %962 = vmatmul.mubr.bf16.vlgmr.msra.gmra.mxu1 %v100_v13  ;;  %973 = vmatpush1.bf16.msra.mxu0 %v1890_v14  ;;  %v1977_v13 = vld [vmem:[#allocation5 + $0x390] ss:$8 sps:$4 sm:$0xff]   ;;  %v1982_v14 = vld [vmem:[#allocation5 + $0x284] ss:$8 sps:$4 sm:$0xff]  }
  0x77   :  { %1016 = vmatpush1.bf16.msra.mxu1 %v1893_v15  ;;  %974 = vmatprep.subr.bf16.mxu0 %v1898_v16  ;;  %v1985_v15 = vld [vmem:[#allocation5 + $0x384] ss:$8 sps:$4 sm:$0xff]   ;;  %v1980_v16 = vld [vmem:[#allocation5 + $0x280] ss:$8 sps:$4 sm:$0xff]  }
  0x78   :  { %1017 = vmatprep.subr.bf16.mxu1 %v1901_v17  ;;  %1004 = vmatprep.mubr.bf16.mxu0 %v103_v45  ;;  %v1983_v17 = vld [vmem:[#allocation5 + $0x380] ss:$8 sps:$4 sm:$0xff]   ;;  %v2016_v45 = vld [vmem:[#allocation7 + $0xd0] ss:$8 sps:$4 sm:$0xff]  }
  0x79   :  { %1047 = vmatprep.mubr.bf16.mxu1 %v105_v49  ;;  %v2022_v49 = vld [vmem:[#allocation7 + $0xb0] ss:$8 sps:$4 sm:$0xff]  }
  0x7a   :  { %975 = vmatpush1.bf16.msra.mxu0 %v1896_v18  ;;  %v86_v18 = vld [vmem:[#allocation2 + $0x20] sm:$0xff] }
  0x7b   :  { %1018 = vmatpush1.bf16.msra.mxu1 %v1899_v19  ;;  %976 = vmatprep.subr.bf16.mxu0 %v1904_v20  ;;  %v94_v19 = vld [vmem:[#allocation2 + $0x60] sm:$0xff]  ;;  %v88_v20 = vld [vmem:[#allocation2 + $0x30] sm:$0xff] }
  0x7c   :  { %1019 = vmatprep.subr.bf16.mxu1 %v1907_v21  ;;  %v96_v21 = vld [vmem:[#allocation2 + $0x70] sm:$0xff] }
  0x7e   :  { %977 = vmatpush1.bf16.msra.mxu0 %v1902_v22  ;;  %v102_v22 = vpack.c.bf16 %v94_v19, %v86_v18  ;;  %v236_v18 = vlaneseq }
  0x7f   :  { %1020 = vmatpush1.bf16.msra.mxu1 %v1905_v23  ;;  %978 = vmatprep.subr.bf16.mxu0 %v1910_v24  ;;  %v104_v23 = vpack.c.bf16 %v96_v21, %v88_v20  ;;  %v1986_v24 = vld [vmem:[#allocation7 + $0x70] ss:$8 sps:$4 sm:$0xff]  }
  0x80   :  { %1021 = vmatprep.subr.bf16.mxu1 %v1913_v25  ;;  %v1988_v25 = vld [vmem:[#allocation7 + $0x74] ss:$8 sps:$4 sm:$0xff]   ;;  %v237_v19 = vshrl.u32 %v236_v18, 7 }
  0x82   :  { %979 = vmatpush1.bf16.msra.mxu0 %v1908_v26  ;;  %v1991_v26 = vld [vmem:[#allocation7 + $0x64] ss:$8 sps:$4 sm:$0xff]  }
  0x83   :  { %1022 = vmatpush1.bf16.msra.mxu1 %v1911_v27  ;;  %980 = vmatprep.subr.bf16.mxu0 %v1916_v28  ;;  %v1989_v27 = vld [vmem:[#allocation7 + $0x60] ss:$8 sps:$4 sm:$0xff]   ;;  %v1994_v28 = vld [vmem:[#allocation7 + $0x54] ss:$8 sps:$4 sm:$0xff]  }
  0x84   :  { %1023 = vmatprep.subr.bf16.mxu1 %v1919_v29  ;;  %v1992_v29 = vld [vmem:[#allocation7 + $0x50] ss:$8 sps:$4 sm:$0xff]  }
  0x86   :  { %981 = vmatpush1.bf16.msra.mxu0 %v1914_v30  ;;  %v1997_v30 = vld [vmem:[#allocation7 + $0x44] ss:$8 sps:$4 sm:$0xff]  }
  0x87   :  { %1024 = vmatpush1.bf16.msra.mxu1 %v1917_v31  ;;  %982 = vmatprep.subr.bf16.mxu0 %v1922_v32  ;;  %v1995_v31 = vld [vmem:[#allocation7 + $0x40] ss:$8 sps:$4 sm:$0xff]   ;;  %v2000_v32 = vld [vmem:[#allocation7 + $0x34] ss:$8 sps:$4 sm:$0xff]  }
  0x88   :  { %1025 = vmatprep.subr.bf16.mxu1 %v1925_v33  ;;  %v1998_v33 = vld [vmem:[#allocation7 + $0x30] ss:$8 sps:$4 sm:$0xff]  }
  0x8a   :  { %983 = vmatpush1.bf16.msra.mxu0 %v1920_v34  ;;  %v2003_v34 = vld [vmem:[#allocation7 + $0x24] ss:$8 sps:$4 sm:$0xff]  }
  0x8b   :  { %1026 = vmatpush1.bf16.msra.mxu1 %v1923_v35  ;;  %984 = vmatprep.subr.bf16.mxu0 %v1928_v36  ;;  %v2001_v35 = vld [vmem:[#allocation7 + $0x20] ss:$8 sps:$4 sm:$0xff]   ;;  %v2006_v36 = vld [vmem:[#allocation7 + $0x14] ss:$8 sps:$4 sm:$0xff]  }
  0x8c   :  { %1027 = vmatprep.subr.bf16.mxu1 %v1931_v37  ;;  %v2004_v37 = vld [vmem:[#allocation7 + $0x10] ss:$8 sps:$4 sm:$0xff]  }
  0x8e   :  { %985 = vmatpush1.bf16.msra.mxu0 %v1926_v38  ;;  %v2009_v38 = vld [vmem:[#allocation7 + $0x4] ss:$8 sps:$4 sm:$0xff]  }
  0x8f   :  { %1028 = vmatpush1.bf16.msra.mxu1 %v1929_v39  ;;  %986 = vmatprep.subr.bf16.mxu0 %v1934_v43  ;;  %v2007_v39 = vld [vmem:[#allocation7] ss:$8 sps:$4 sm:$0xff]  }
  0x90   :  { %1029 = vmatprep.subr.bf16.mxu1 %v1937_v44  ;;  %v2013_v43 = vld [vmem:[#allocation7 + $0xe0] ss:$8 sps:$4 sm:$0xff]   ;;  %v2018_v44 = vld [vmem:[#allocation7 + $0xd4] ss:$8 sps:$4 sm:$0xff]  }
  0x92   :  { %987 = vmatpush1.bf16.msra.mxu0 %v1932_v47  ;;  %v2019_v47 = vld [vmem:[#allocation7 + $0xc0] ss:$8 sps:$4 sm:$0xff]  }
  0x93   :  { %1030 = vmatpush1.bf16.msra.mxu1 %v1935_v48  ;;  %988 = vmatprep.subr.bf16.mxu0 %v1940_v50  ;;  %v2024_v48 = vld [vmem:[#allocation7 + $0xb4] ss:$8 sps:$4 sm:$0xff]   ;;  %v2027_v50 = vld [vmem:[#allocation7 + $0xa4] ss:$8 sps:$4 sm:$0xff]  }
  0x94   :  { %1031 = vmatprep.subr.bf16.mxu1 %v1943_v51  ;;  %v2025_v51 = vld [vmem:[#allocation7 + $0xa0] ss:$8 sps:$4 sm:$0xff]  }
  0x96   :  { %989 = vmatpush2.bf16.msra.mxu0 %v1938_v52  ;;  %v2030_v52 = vld [vmem:[#allocation7 + $0x94] ss:$8 sps:$4 sm:$0xff]  }
  0x97   :  { %1032 = vmatpush2.bf16.msra.mxu1 %v1941_v53  ;;  %990 = vmatprep.subr.bf16.mxu0 %v1946_v54  ;;  %v2028_v53 = vld [vmem:[#allocation7 + $0x90] ss:$8 sps:$4 sm:$0xff]   ;;  %v2033_v54 = vld [vmem:[#allocation7 + $0x84] ss:$8 sps:$4 sm:$0xff]  }
  0x98   :  { %1033 = vmatprep.subr.bf16.mxu1 %v1949_v55  ;;  %v2031_v55 = vld [vmem:[#allocation7 + $0x80] ss:$8 sps:$4 sm:$0xff]  }
  0x9a   :  { %991 = vmatpush2.bf16.msra.mxu0 %v1944_v56  ;;  %v2034_v56 = vld [vmem:[#allocation8 + $0x70] ss:$8 sps:$4 sm:$0xff]  }
  0x9b   :  { %1034 = vmatpush2.bf16.msra.mxu1 %v1947_v57  ;;  %992 = vmatprep.subr.bf16.mxu0 %v1952_v58  ;;  %v2036_v57 = vld [vmem:[#allocation8 + $0x74] ss:$8 sps:$4 sm:$0xff]   ;;  %v2039_v58 = vld [vmem:[#allocation8 + $0x64] ss:$8 sps:$4 sm:$0xff]  }
  0x9c   :  { %1035 = vmatprep.subr.bf16.mxu1 %v1955_v59  ;;  %v2037_v59 = vld [vmem:[#allocation8 + $0x60] ss:$8 sps:$4 sm:$0xff]  }
  0x9e   :  { %993 = vmatpush2.bf16.msra.mxu0 %v1950_v60  ;;  %v2042_v60 = vld [vmem:[#allocation8 + $0x54] ss:$8 sps:$4 sm:$0xff]  }
  0x9f   :  { %1036 = vmatpush2.bf16.msra.mxu1 %v1953_v61  ;;  %994 = vmatprep.subr.bf16.mxu0 %v1958_v62  ;;  %v2040_v61 = vld [vmem:[#allocation8 + $0x50] ss:$8 sps:$4 sm:$0xff]   ;;  %v2045_v62 = vld [vmem:[#allocation8 + $0x44] ss:$8 sps:$4 sm:$0xff]  }
  0xa0   :  { %1037 = vmatprep.subr.bf16.mxu1 %v1961_v63  ;;  %v2043_v63 = vld [vmem:[#allocation8 + $0x40] ss:$8 sps:$4 sm:$0xff]  }
  0xa2   :  { %995 = vmatpush2.bf16.msra.mxu0 %v1956_v0  ;;  %v2048_v0 = vld [vmem:[#allocation8 + $0x34] ss:$8 sps:$4 sm:$0xff]  }
  0xa3   :  { %1038 = vmatpush2.bf16.msra.mxu1 %v1959_v1  ;;  %996 = vmatprep.subr.bf16.mxu0 %v1964_v2  ;;  %v2046_v1 = vld [vmem:[#allocation8 + $0x30] ss:$8 sps:$4 sm:$0xff]   ;;  %v2051_v2 = vld [vmem:[#allocation8 + $0x24] ss:$8 sps:$4 sm:$0xff]  }
  0xa4   :  { %1039 = vmatprep.subr.bf16.mxu1 %v1967_v3  ;;  %v2049_v3 = vld [vmem:[#allocation8 + $0x20] ss:$8 sps:$4 sm:$0xff]  }
  0xa6   :  { %997 = vmatpush2.bf16.msra.mxu0 %v1962_v4  ;;  %v2054_v4 = vld [vmem:[#allocation8 + $0x14] ss:$8 sps:$4 sm:$0xff]  }
  0xa7   :  { %1040 = vmatpush2.bf16.msra.mxu1 %v1965_v5  ;;  %998 = vmatprep.subr.bf16.mxu0 %v1970_v6  ;;  %v2052_v5 = vld [vmem:[#allocation8 + $0x10] ss:$8 sps:$4 sm:$0xff]   ;;  %v2057_v6 = vld [vmem:[#allocation8 + $0x4] ss:$8 sps:$4 sm:$0xff]  }
  0xa8   :  { %1041 = vmatprep.subr.bf16.mxu1 %v1973_v7  ;;  %v2055_v7 = vld [vmem:[#allocation8] ss:$8 sps:$4 sm:$0xff]  }
  0xaa   :  { %999 = vmatpush2.bf16.msra.mxu0 %v1968_v8  ;;  %v2060_v8 = vld [vmem:[#allocation8 + $0xf4] ss:$8 sps:$4 sm:$0xff]  }
  0xab   :  { %1042 = vmatpush2.bf16.msra.mxu1 %v1971_v9  ;;  %1000 = vmatprep.subr.bf16.mxu0 %v1976_v10  ;;  %v2058_v9 = vld [vmem:[#allocation8 + $0xf0] ss:$8 sps:$4 sm:$0xff]   ;;  %v2063_v10 = vld [vmem:[#allocation8 + $0xe4] ss:$8 sps:$4 sm:$0xff]  }
  0xac   :  { %1043 = vmatprep.subr.bf16.mxu1 %v1979_v11  ;;  %v2061_v11 = vld [vmem:[#allocation8 + $0xe0] ss:$8 sps:$4 sm:$0xff]  }
  0xae   :  { %1001 = vmatpush2.bf16.msra.mxu0 %v1974_v12  ;;  %v2066_v12 = vld [vmem:[#allocation8 + $0xd4] ss:$8 sps:$4 sm:$0xff]  }
  0xaf   :  { %1044 = vmatpush2.bf16.msra.mxu1 %v1977_v13  ;;  %1002 = vmatprep.subr.bf16.mxu0 %v1982_v14  ;;  %v2064_v13 = vld [vmem:[#allocation8 + $0xd0] ss:$8 sps:$4 sm:$0xff]   ;;  %v2069_v14 = vld [vmem:[#allocation8 + $0xc4] ss:$8 sps:$4 sm:$0xff]  }
  0xb0   :  { %1045 = vmatprep.subr.bf16.mxu1 %v1985_v15  ;;  %v2067_v15 = vld [vmem:[#allocation8 + $0xc0] ss:$8 sps:$4 sm:$0xff]  }
  0xb2   :  { %1003 = vmatpush2.bf16.msra.mxu0 %v1980_v16  ;;  %v2072_v16 = vld [vmem:[#allocation8 + $0xb4] ss:$8 sps:$4 sm:$0xff]  }
  0xb3   :  { %1046 = vmatpush2.bf16.msra.mxu1 %v1983_v17  ;;  %1268 = vmatprep.subr.bf16.mxu0 %v1988_v25  ;;  %v2070_v17 = vld [vmem:[#allocation8 + $0xb0] ss:$8 sps:$4 sm:$0xff]  }
  0xb4   :  { %1521 = vmatprep.subr.bf16.mxu1 %v2036_v57 }
  0xb5   :  { %1005 = vmatmul.mubr.bf16.vlgmr.msra.gmra.mxu0 %v102_v22  ;;  %v2262_v22 = vsub.s32 1, %v237_v19 }
  0xb6   :  { %1048 = vmatmul.mubr.bf16.vlgmr.msra.gmra.mxu1 %v104_v23  ;;  %1269 = vmatpush1.bf16.msra.mxu0 %v1986_v24  ;;  %v234_v23 = vld [vmem:[%s2286_s2] sm:$0x3]  ;;  %v2267_v24 = vsub.s32 0, %v237_v19 }
  0xb7   :  { %1270 = vmatprep.subr.bf16.mxu0 %v1991_v26  ;;  %1522 = vmatpush1.bf16.msra.mxu1 %v2034_v56 }
  0xb8   :  { %1523 = vmatprep.subr.bf16.mxu1 %v2039_v58 }
  0xba   :  { %1271 = vmatpush1.bf16.msra.mxu0 %v1989_v27  ;;  %v243_v27 = vrot.slane %v234_v23, %v2262_v22 }
  0xbb   :  { %1272 = vmatprep.subr.bf16.mxu0 %v1994_v28  ;;  %1524 = vmatpush1.bf16.msra.mxu1 %v2037_v59  ;;  %v239_v28 = vrot.slane %v234_v23, %v2267_v24  ;;  %v1349_v23 = vld [vmem:[%s2290_s6] sm:$0x3]  ;;  %s2162_s6 = scalar_lea.vmem %s1578_s26, 512 }
  0xbc   :  { %1525 = vmatprep.subr.bf16.mxu1 %v2042_v60  ;;  %p2163_p6 = scmp.ne.s32.totalorder %s1578_s26, %s2162_s6  ;;  %p2168_p8 = scmp.lt.s32.totalorder %s2162_s6, %s2162_s6 }
  0xbe   :  { %1273 = vmatpush1.bf16.msra.mxu0 %v1992_v29  ;;  %p2169_p9 = por %p2168_p8, %p2167_p7 }
  0xbf   :  { %1274 = vmatprep.subr.bf16.mxu0 %v1997_v30  ;;  %1526 = vmatpush1.bf16.msra.mxu1 %v2040_v61 }
  0xc0   :  { %1527 = vmatprep.subr.bf16.mxu1 %v2045_v62  ;;  %p2170_p10 = pnand %p2169_p9, %p2163_p6 }
  0xc2   :  { %1275 = vmatpush1.bf16.msra.mxu0 %v1995_v31 }
  0xc3   :  { %1276 = vmatprep.subr.bf16.mxu0 %v2000_v32  ;;  %1528 = vmatpush1.bf16.msra.mxu1 %v2043_v63  ;;  %v2075_v63 = vld [vmem:[#allocation8 + $0xa4] ss:$8 sps:$4 sm:$0xff]  }
  0xc4   :  { %1529 = vmatprep.subr.bf16.mxu1 %v2048_v0  ;;  %v2073_v0 = vld [vmem:[#allocation8 + $0xa0] ss:$8 sps:$4 sm:$0xff]  }
  0xc6   :  { %1277 = vmatpush1.bf16.msra.mxu0 %v1998_v33 }
  0xc7   :  { %1278 = vmatprep.subr.bf16.mxu0 %v2003_v34  ;;  %1530 = vmatpush1.bf16.msra.mxu1 %v2046_v1  ;;  %v2078_v1 = vld [vmem:[#allocation8 + $0x94] ss:$8 sps:$4 sm:$0xff]  }
  0xc8   :  { %1531 = vmatprep.subr.bf16.mxu1 %v2051_v2  ;;  %v2076_v2 = vld [vmem:[#allocation8 + $0x90] ss:$8 sps:$4 sm:$0xff]  }
  0xca   :  { %1279 = vmatpush1.bf16.msra.mxu0 %v2001_v35 }
  0xcb   :  { %1280 = vmatprep.subr.bf16.mxu0 %v2006_v36  ;;  %1532 = vmatpush1.bf16.msra.mxu1 %v2049_v3  ;;  %v2081_v3 = vld [vmem:[#allocation8 + $0x84] ss:$8 sps:$4 sm:$0xff]  }
  0xcc   :  { %1533 = vmatprep.subr.bf16.mxu1 %v2054_v4  ;;  %v2079_v4 = vld [vmem:[#allocation8 + $0x80] ss:$8 sps:$4 sm:$0xff]  }
  0xce   :  { %1281 = vmatpush1.bf16.msra.mxu0 %v2004_v37 }
  0xcf   :  { %1282 = vmatprep.subr.bf16.mxu0 %v2009_v38  ;;  %1534 = vmatpush1.bf16.msra.mxu1 %v2052_v5  ;;  %v1096_v5 = vld [vmem:[%s2288_s4] sm:$0x3] }
  0xd0   :  { %1535 = vmatprep.subr.bf16.mxu1 %v2057_v6 }
  0xd2   :  { %1283 = vmatpush1.bf16.msra.mxu0 %v2007_v39 }
  0xd3   :  { %1284 = vmatprep.subr.bf16.mxu0 %v2012_v40  ;;  %1536 = vmatpush1.bf16.msra.mxu1 %v2055_v7  ;;  %v1105_v7 = vrot.slane %v1096_v5, %v2262_v22 }
  0xd4   :  { %1537 = vmatprep.subr.bf16.mxu1 %v2060_v8  ;;  %v1101_v8 = vrot.slane %v1096_v5, %v2267_v24 }
  0xd6   :  { %1285 = vmatpush2.bf16.msra.mxu0 %v2010_v41 }
  0xd7   :  { %1286 = vmatprep.subr.bf16.mxu0 %v2015_v42  ;;  %1538 = vmatpush2.bf16.msra.mxu1 %v2058_v9 }
  0xd8   :  { %1539 = vmatprep.subr.bf16.mxu1 %v2063_v10 }
  0xda   :  { %1287 = vmatpush2.bf16.msra.mxu0 %v2013_v43 }
  0xdb   :  { %1288 = vmatprep.subr.bf16.mxu0 %v2018_v44  ;;  %1540 = vmatpush2.bf16.msra.mxu1 %v2061_v11 }
  0xdc   :  { %1541 = vmatprep.subr.bf16.mxu1 %v2066_v12 }
  0xde   :  { %1289 = vmatpush2.bf16.msra.mxu0 %v2016_v45 }
  0xdf   :  { %1290 = vmatprep.subr.bf16.mxu0 %v2021_v46  ;;  %1542 = vmatpush2.bf16.msra.mxu1 %v2064_v13 }
  0xe0   :  { %1543 = vmatprep.subr.bf16.mxu1 %v2069_v14 }
  0xe2   :  { %1291 = vmatpush2.bf16.msra.mxu0 %v2019_v47 }
  0xe3   :  { %1292 = vmatprep.subr.bf16.mxu0 %v2024_v48  ;;  %1544 = vmatpush2.bf16.msra.mxu1 %v2067_v15 }
  0xe4   :  { %1545 = vmatprep.subr.bf16.mxu1 %v2072_v16 }
  0xe6   :  { %1293 = vmatpush2.bf16.msra.mxu0 %v2022_v49 }
  0xe7   :  { %1294 = vmatprep.subr.bf16.mxu0 %v2027_v50  ;;  %1546 = vmatpush2.bf16.msra.mxu1 %v2070_v17 }
  0xe8   :  { %1547 = vmatprep.subr.bf16.mxu1 %v2075_v63 }
  0xea   :  { %1295 = vmatpush2.bf16.msra.mxu0 %v2025_v51 }
  0xeb   :  { %1296 = vmatprep.subr.bf16.mxu0 %v2030_v52  ;;  %1548 = vmatpush2.bf16.msra.mxu1 %v2073_v0 }
  0xec   :  { %1549 = vmatprep.subr.bf16.mxu1 %v2078_v1 }
  0xee   :  { %1297 = vmatpush2.bf16.msra.mxu0 %v2028_v53 }
  0xef   :  { %1298 = vmatprep.subr.bf16.mxu0 %v2033_v54  ;;  %1550 = vmatpush2.bf16.msra.mxu1 %v2076_v2 }
  0xf0   :  { %1551 = vmatprep.subr.bf16.mxu1 %v2081_v3 }
  0xf2   :  { %1299 = vmatpush2.bf16.msra.mxu0 %v2031_v55 }
  0xf3   :  { %1552 = vmatpush2.bf16.msra.mxu1 %v2079_v4 }
 0x135   :  { %v920_v20 = vpop.f32.mrf.mxu0 }
 0x136   :  { %v963_v21 = vpop.f32.mrf.mxu1  ;;  %v921_v32 = vadd.f32 %v920_v20, %v239_v28 }
 0x137   :  { %v922_v25 = vpop.f32.mrf.mxu0 }
 0x138   :  { %v965_v26 = vpop.f32.mrf.mxu1  ;;  %v923_v31 = vadd.f32 %v922_v25, %v243_v27  ;;  %v964_v40 = vadd.f32 %v963_v21, %v921_v32  ;;  %v1354_v25 = vrot.slane %v1349_v23, %v2267_v24 }
 0x139   :  { %v924_v29 = vpop.f32.mrf.mxu0 }
 0x13a   :  { %v967_v30 = vpop.f32.mrf.mxu1  ;;  %v925_v35 = vadd.f32 %v924_v29, %v239_v28  ;;  %v966_v38 = vadd.f32 %v965_v26, %v923_v31  ;;  %v1358_v26 = vrot.slane %v1349_v23, %v2262_v22 }
 0x13b   :  { %v926_v33 = vpop.f32.mrf.mxu0 }
 0x13c   :  { %v969_v34 = vpop.f32.mrf.mxu1  ;;  %v927_v39 = vadd.f32 %v926_v33, %v243_v27  ;;  %v968_v43 = vadd.f32 %v967_v30, %v925_v35 }
 0x13e   :  { %v970_v48 = vadd.f32 %v969_v34, %v927_v39 }
 0x175   :  { %v1006_v36 = vpop.f32.mrf.mxu0 }
 0x176   :  { %v1049_v37 = vpop.f32.mrf.mxu1  ;;  %v1007_v45 = vadd.f32 %v1006_v36, %v964_v40 }
 0x177   :  { %v1008_v41 = vpop.f32.mrf.mxu0 }
 0x178   :  { %v1051_v42 = vpop.f32.mrf.mxu1  ;;  %v1009_v44 = vadd.f32 %v1008_v41, %v966_v38  ;;  %v1050_v54 = vadd.f32 %v1049_v37, %v1007_v45 }
 0x179   :  { %v1010_v46 = vpop.f32.mrf.mxu0 }
 0x17a   :  { %v1053_v47 = vpop.f32.mrf.mxu1  ;;  %v1011_v49 = vadd.f32 %v1010_v46, %v968_v43  ;;  %v1052_v51 = vadd.f32 %v1051_v42, %v1009_v44  ;;  %v1058_v60 = vmax.f32 %v1050_v54, 0.0 }
 0x17b   :  { %v1012_v50 = vpop.f32.mrf.mxu0 }
 0x17c   :  { %v1054_v52 = vadd.f32 %v1053_v47, %v1011_v49  ;;  %v1013_v53 = vadd.f32 %v1012_v50, %v970_v48  ;;  %v1055_v55 = vpop.f32.mrf.mxu1  ;;  %v1059_v58 = vmax.f32 %v1052_v51, 0.0 }
 0x17e   :  { %v1056_v56 = vadd.f32 %v1055_v55, %v1013_v53  ;;  %v1060_v57 = vmax.f32 %v1054_v52, 0.0 }
 0x180   :  { %v1061_v59 = vmax.f32 %v1056_v56, 0.0  ;;  %v1062_v62 = vpack.c.bf16 %v1060_v57, %v1058_v60 }
 0x182   :  { %v1063_v61 = vpack.c.bf16 %v1061_v59, %v1059_v58 }
 0x184   :  { %1300 = vmatprep.mubr.bf16.mxu0 %v1063_v61 }
 0x185   :  { %1301 = vmatmul.mubr.bf16.vlgmr.msra.gmra.mxu0 %v1062_v62 }
 0x245   :  { %v1302_v6 = vpop.f32.mrf.mxu0 }
 0x246   :  { %v1303_v13 = vadd.f32 %v1302_v6, %v1101_v8 }
 0x247   :  { %v1304_v9 = vpop.f32.mrf.mxu0 }
 0x248   :  { %v1305_v11 = vadd.f32 %v1304_v9, %v1105_v7  ;;  %v1311_v19 = vmax.f32 %v1303_v13, 0.0 }
 0x249   :  { %v1306_v10 = vpop.f32.mrf.mxu0 }
 0x24a   :  { %v1307_v12 = vadd.f32 %v1306_v10, %v1101_v8  ;;  %v1312_v17 = vmax.f32 %v1305_v11, 0.0 }
 0x24b   :  { %v1308_v14 = vpop.f32.mrf.mxu0 }
 0x24c   :  { %v1309_v15 = vadd.f32 %v1308_v14, %v1105_v7  ;;  %v1313_v16 = vmax.f32 %v1307_v12, 0.0 }
 0x24e   :  { %v1314_v18 = vmax.f32 %v1309_v15, 0.0  ;;  %v1315_v21 = vpack.c.bf16 %v1313_v16, %v1311_v19 }
 0x250   :  { %v1316_v20 = vpack.c.bf16 %v1314_v18, %v1312_v17 }
 0x252   :  { %1553 = vmatprep.mubr.bf16.mxu1 %v1316_v20 }
 0x253   :  { %1554 = vmatmul.mubr.bf16.vlgmr.msra.gmra.mxu1 %v1315_v21 }
 0x313   :  { %v1555_v27 = vpop.f32.mrf.mxu1 }
 0x314   :  { %v1556_v28 = vadd.f32 %v1555_v27, %v1354_v25 }
 0x315   :  { %v1557_v29 = vpop.f32.mrf.mxu1 }
 0x316   :  { %v1564_v30 = vmax.f32 %v1556_v28, 0.0  ;;  %v1558_v31 = vadd.f32 %v1557_v29, %v1358_v26 }
 0x317   :  { %v1559_v32 = vpop.f32.mrf.mxu1 }
 0x318   :  { %1568 = vst [vmem:[#allocation10] sm:$0xff] %v1564_v30  ;;  %v1565_v33 = vmax.f32 %v1558_v31, 0.0  ;;  %v1560_v34 = vadd.f32 %v1559_v32, %v1354_v25 }
 0x319   :  { %v1561_v35 = vpop.f32.mrf.mxu1 }
 0x31a   :  { %1569 = vst [vmem:[#allocation10 + $0x8] sm:$0xff] %v1565_v33  ;;  %v1566_v36 = vmax.f32 %v1560_v34, 0.0  ;;  %v1562_v37 = vadd.f32 %v1561_v35, %v1358_v26 }
 0x31c   :  { %1570 = vst [vmem:[#allocation10 + $0x10] sm:$0xff] %v1566_v36  ;;  %v1567_v24 = vmax.f32 %v1562_v37, 0.0 }
 0x31e   :  { %1571 = vst [vmem:[#allocation10 + $0x18] sm:$0xff] %v1567_v24 }
 0x31f   :  { %2173 = shalt.err (!%p2170_p10)
}
 0x320   :  { %s2199_s27 = smov 256   ;;  %s2200_s28 = smov 16  }
 0x321   :  { %1583 = dma.vmem_to_hbm [thread:$0]  %s1578_s26, 512, %s2291_s7, [#allocation4], %s2199_s27, %s2199_s27, %s2200_s28  }
 0x322   :  { %2188 = dma.done.wait [#allocation4], 512  }
 0x323   :  { %2189 = vsyncadd [#allocation4], 4294966784 }
 0x324   :  { %1587 = vsyncpa [#allocation3], 1 }
 0x325   :  { %1588 = vsyncpa [#allocation6], 1 }
 0x326   :  { %1589 = vsyncpa [#allocation9], 1 }
 0x327   :  { %1590 = vsyncpa [#allocation4], 1 }

</bundles_post_ra>
